<compile_context>
chip_gen: v5e
topology: v5e:2x2
jax: 0.10.0
libtpu: 0.0.40
codegen_flags: <defaults>
</compile_context>

<pallas_src>
import functools

import jax
import jax.numpy as jnp
from jax.experimental import pallas as pl
from jax.experimental.pallas import tpu as pltpu


_VMEM_LIMIT = 48 * 1024 * 1024        # <= v7x's 64 MiB physical VMEM per core


def _round_up(x, m):
    return (x + m - 1) // m * m


def _detect_tn_cap():
    """512 on dual-TensorCore chips (v7x) so j>=2 feeds both cores;
    1024 on single-TC chips (v5e/v6e) to halve deep-layer step counts."""
    try:
        kind = jax.devices()[0].device_kind.lower()
    except Exception:
        return 512
    if "v7" in kind or "7x" in kind:
        return 512
    return 1024


_TN_CAP = _detect_tn_cap()


# ---------------------------------------------------------------------------
# Fused conv(k=4,s=2,p=1) + bias [+ InstanceNorm(affine=False)] [+ LeakyReLU]
#
# Parity-plane formulation: P[ph,pw][r, c, :] = x_pad[2r+ph, 2c+pw, :], shape
# (Ho+1, Wo+1, Cin), flattened per sample to (Lp, Cin).  For tap
# (kh, kw) = (2a+ph, 2b+pw) the contribution to the "wide" output index
# m' = ho*(Wo+1) + wo is P_flat[a*(Wo+1) + b + m', :] @ W[kh, kw], i.e. a
# plain matmul on a CONTIGUOUS window of the flattened plane.  The wide output
# has one junk column per row (wo == Wo) which is masked out of the
# InstanceNorm statistics and stripped by the (XLA-fused) reshape that feeds
# the next layer's parity-plane build.
# ---------------------------------------------------------------------------
def _conv_kernel(a_ref, w_ref, b_ref, o_ref, acc_ref, *,
                 wp, mw, hw, nb, fuse_norm, apply_act):
    p = pl.program_id(2)

    @pl.when(p == 0)
    def _():
        acc_ref[...] = jnp.zeros_like(acc_ref)

    offsets = (0, 1, wp, wp + 1)          # (a, b) = (0,0), (0,1), (1,0), (1,1)
    for n in range(nb):                   # static; nb <= batch
        part = None
        for t in range(4):
            a = a_ref[0, n, pl.ds(offsets[t], mw), :]        # (mw, Cin) bf16
            w = w_ref[0, t]                                  # (Cin, tn) bf16
            d = jnp.dot(a, w, preferred_element_type=jnp.float32)
            part = d if part is None else part + d
        acc_ref[n] = acc_ref[n] + part

    @pl.when(p == pl.num_programs(2) - 1)
    def _():
        y = acc_ref[...] + b_ref[...].astype(jnp.float32).reshape(1, 1, -1)
        if fuse_norm:
            # wide-layout junk columns sit at m' % wp == wp - 1
            col = jax.lax.broadcasted_iota(jnp.int32, (1, mw, 1), 1)
            mask = (col % wp) != (wp - 1)
            inv_n = 1.0 / float(hw)
            ym = jnp.where(mask, y, 0.0)
            mean = jnp.sum(ym, axis=1, keepdims=True) * inv_n
            cen = jnp.where(mask, y - mean, 0.0)
            var = jnp.sum(cen * cen, axis=1, keepdims=True) * inv_n
            y = (y - mean) * jax.lax.rsqrt(var + 1e-5)
            y = jnp.where(y > 0, y, 0.2 * y)                 # LeakyReLU(0.2)
            y = jnp.where(mask, y, 0.0)
        elif apply_act:
            y = jnp.where(y > 0, y, 0.2 * y)                 # LeakyReLU(0.2)
        o_ref[...] = y.astype(o_ref.dtype)


def conv_block(x_nhwc, w_par, b, *, fuse_norm, apply_act,
               out_dtype=jnp.bfloat16):
    """One Conv2d(k=4, s=2, p=1) layer, optionally fused with
    InstanceNorm2d(affine=False) and/or LeakyReLU(0.2).

    x_nhwc: (N, H, W, Cin); w_par: (4, 4, Cin, Cout) parity-arranged weights;
    b: bias with Cout elements.  Returns (N, H//2, W//2, Cout).
    """
    N, H, W, C = x_nhwc.shape
    Ho, Wo = H // 2, W // 2
    Hp, Wp = Ho + 1, Wo + 1
    Mw, HW = Ho * Wp, Ho * Wo
    Cout = w_par.shape[-1]

    # --- layer plan --------------------------------------------------------
    # batch inside the block for the deep layers (big weights stream once),
    # batch on a parallel grid axis for the large early layers (weights tiny).
    nb = 1 if HW >= 1024 else N
    tn = min(_TN_CAP, Cout)
    if _TN_CAP == 512 and nb == N and Cout >= 256 and Cout // tn < 2:
        tn = Cout // 2            # dual-TC: guarantee j >= 2 (layer 3)
    Lp = _round_up(Mw + Wp + 2, 8)    # flattened plane length (+slack, 8-aligned)

    # --- parity planes (XLA glue; ~1x activation bytes, no 4x patch matrix) --
    xp = jnp.pad(x_nhwc.astype(jnp.bfloat16), ((0, 0), (1, 1), (1, 1), (0, 0)))
    planes = []
    for ph in range(2):
        for pw in range(2):
            planes.append(xp[:, ph::2, pw::2, :].reshape(N, Hp * Wp, C))
    pp = jnp.stack(planes, axis=0)                           # (4, N, Hp*Wp, C)
    pp = jnp.pad(pp, ((0, 0), (0, 0), (0, Lp - Hp * Wp), (0, 0)))

    w_par = w_par.astype(jnp.bfloat16)
    b2 = b.reshape(1, Cout).astype(jnp.float32)

    grid = (N // nb, Cout // tn, 4)
    kernel = functools.partial(_conv_kernel, wp=Wp, mw=Mw, hw=HW, nb=nb,
                               fuse_norm=fuse_norm, apply_act=apply_act)
    # TODO(synk): pipeline_mode=pl.Buffered(3) on the weight spec would close
    # the small j-boundary DMA bubble on the deep weight-streaming layers;
    # left at default double-buffering for lowering safety.
    out_wide = pl.pallas_call(
        kernel,
        out_shape=jax.ShapeDtypeStruct((N, Mw, Cout), out_dtype),
        grid_spec=pltpu.PrefetchScalarGridSpec(
            num_scalar_prefetch=0,
            grid=grid,
            in_specs=[
                pl.BlockSpec((1, nb, Lp, C), lambda i, j, p: (p, i, 0, 0)),
                pl.BlockSpec((1, 4, C, tn), lambda i, j, p: (p, 0, 0, j)),
                pl.BlockSpec((1, tn), lambda i, j, p: (0, j)),
            ],
            out_specs=pl.BlockSpec((nb, Mw, tn), lambda i, j, p: (i, 0, j)),
            scratch_shapes=[pltpu.VMEM((nb, Mw, tn), jnp.float32)],
        ),
        compiler_params=pltpu.CompilerParams(
            dimension_semantics=("parallel", "parallel", "arbitrary"),
            vmem_limit_bytes=_VMEM_LIMIT,
        ),
    )(pp, w_par, b2)

    # strip the wide junk column; this reshape/slice fuses into the next
    # layer's parity-plane build, no standalone big copy is materialized.
    return out_wide.reshape(N, Ho, Wp, Cout)[:, :, :Wo, :]


# ---------------------------------------------------------------------------
# Parameters + forward
# ---------------------------------------------------------------------------
def _weights_to_parity(w_oihw):
    """(Cout, Cin, 4, 4) -> (parity=4, tap=4, Cin, Cout) for the Pallas kernel."""
    cout, cin, kh, kw = w_oihw.shape
    assert kh == 4 and kw == 4
    w4 = jnp.transpose(w_oihw, (2, 3, 1, 0))                 # (kh, kw, Cin, Cout)
    w6 = w4.reshape(2, 2, 2, 2, cin, cout)                   # (a, ph, b, pw, ., .)
    return jnp.transpose(w6, (1, 3, 0, 2, 4, 5)).reshape(4, 4, cin, cout)


def init_params(key, input_c, conv_k=4):
    assert conv_k == 4
    channel_list = [128, 256, 512, 1024, 1024, 1024]
    chans = [(input_c, 64)]
    c0 = 64
    for cc in channel_list:
        chans.append((c0, cc))
        c0 = cc
    chans.append((c0, 1024))                                 # self.mean conv
    params = []
    for i, (ci, co) in enumerate(chans):
        wkey = jax.random.fold_in(key, i)
        std = 1.0 / jnp.sqrt(jnp.float32(ci * conv_k * conv_k))
        w = jax.random.normal(wkey, (co, ci, conv_k, conv_k), jnp.float32) * std
        params.append((_weights_to_parity(w).astype(jnp.bfloat16),
                       jnp.zeros((1, co), jnp.float32)))
    return params


@jax.jit
def appear_enc_forward(x_nchw, params, noise_key):
    # NCHW (torch) -> NHWC (kernels); bf16 activations.
    x = jnp.transpose(x_nchw, (0, 2, 3, 1)).astype(jnp.bfloat16)
    n_enc = len(params) - 1
    for i in range(n_enc):
        w_par, b = params[i]
        # layer 0: LeakyReLU only; layers 1..6: fused InstanceNorm + LeakyReLU.
        x = conv_block(x, w_par, b, fuse_norm=(i > 0), apply_act=(i == 0))
    w_par, b = params[-1]
    z = conv_block(x, w_par, b, fuse_norm=False, apply_act=False,
                   out_dtype=jnp.float32)                    # (N, 1, 1, 1024)
    z_mu = jnp.transpose(z, (0, 3, 1, 2))                    # back to NCHW

    # sample_z: z_mu + 1.0 * eps (jax RNG stands in for torch.randn)
    eps = jax.random.normal(noise_key, z_mu.shape, z_mu.dtype)
    sample_z = z_mu + 1.0 * eps

    # kl_loss, faithful to the reference (z_var == 1 everywhere):
    # mean(0.5 * sum_c(exp(1) + mu^2 - 1 - 1))
    kl_loss = jnp.mean(0.5 * jnp.sum(jnp.exp(1.0) + z_mu ** 2 - 2.0, axis=1))
    return sample_z, kl_loss, z_mu


# ---------------------------------------------------------------------------
# Small numerical self-check of the fused conv block vs lax.conv reference
# ---------------------------------------------------------------------------
def _reference_block(x, w, b, fuse_norm):
    x32 = x.astype(jnp.bfloat16).astype(jnp.float32)
    w32 = w.astype(jnp.bfloat16).astype(jnp.float32)
    whwio = jnp.transpose(w32, (2, 3, 1, 0))
    y = jax.lax.conv_general_dilated(
        x32, whwio, window_strides=(2, 2), padding=((1, 1), (1, 1)),
        dimension_numbers=("NHWC", "HWIO", "NHWC"),
        precision=jax.lax.Precision.HIGHEST) + b.reshape(1, 1, 1, -1)
    if fuse_norm:
        mean = jnp.mean(y, axis=(1, 2), keepdims=True)
        var = jnp.mean((y - mean) ** 2, axis=(1, 2), keepdims=True)
        y = (y - mean) * jax.lax.rsqrt(var + 1e-5)
    return jnp.where(y > 0, y, 0.2 * y)


def _self_check():
    key = jax.random.PRNGKey(7)
    for idx, (cin, cout, fuse) in enumerate([(3, 64, False), (8, 128, True)]):
        k = jax.random.fold_in(key, idx)
        x = jax.random.normal(jax.random.fold_in(k, 0), (2, 16, 16, cin),
                              jnp.float32)
        w = jax.random.normal(jax.random.fold_in(k, 1), (cout, cin, 4, 4),
                              jnp.float32) / jnp.sqrt(16.0 * cin)
        b = jax.random.normal(jax.random.fold_in(k, 2), (1, cout),
                              jnp.float32) * 0.1
        got = conv_block(x.astype(jnp.bfloat16), _weights_to_parity(w), b,
                         fuse_norm=fuse, apply_act=not fuse)
        want = _reference_block(x, w, b, fuse)
        err = float(jnp.max(jnp.abs(got.astype(jnp.float32) - want)))
        assert err < 6e-2, f"conv_block self-check failed (cfg {idx}): {err}"


if __name__ == "__main__":
    _self_check()

    key = jax.random.PRNGKey(0)
    input_c = 3
    # 8 stride-2 k=4 convs need spatial 256 for a valid 1x1 latent
    # (matches the module's size_=256 default). Batch kept small.
    N, H, W = 2, 256, 256
    x = jax.random.normal(jax.random.fold_in(key, 100),
                          (N, input_c, H, W), jnp.float32)
    params = init_params(jax.random.fold_in(key, 200), input_c)

    sample_z, kl_loss, z_mu = appear_enc_forward(
        x, params, jax.random.fold_in(key, 300))
    jax.block_until_ready((sample_z, kl_loss, z_mu))

    assert sample_z.shape == (N, 1024, 1, 1)
    assert z_mu.shape == (N, 1024, 1, 1)
    assert kl_loss.shape == ()
    assert bool(jnp.isfinite(kl_loss))
    print("KERNEL_OK")
</pallas_src>

<mosaic_0001>
module attributes {stable_mosaic.version = 11 : i64} {
  func.func @_conv_kernel(%arg0: i32, %arg1: i32, %arg2: i32, %arg3: memref<1x2x88x3xbf16, #tpu.memory_space<vmem>>, %arg4: memref<1x4x3x64xbf16, #tpu.memory_space<vmem>>, %arg5: memref<1x64xf32, #tpu.memory_space<vmem>>, %arg6: memref<2x72x64xbf16, #tpu.memory_space<vmem>>, %arg7: memref<2x72x64xf32, #tpu.memory_space<vmem>>) attributes {dimension_semantics = [#tpu.dimension_semantics<parallel>, #tpu.dimension_semantics<parallel>, #tpu.dimension_semantics<arbitrary>], iteration_bounds = array<i64: 1, 1, 4>, scalar_prefetch = 0 : i64, scratch_operands = 1 : i64, tpu.core_type = #tpu.core_type<tc>, window_params = [{transform_indices = @transform_0, window_bounds = array<i64: 1, 2, 88, 3>}, {transform_indices = @transform_1, window_bounds = array<i64: 1, 4, 3, 64>}, {transform_indices = @transform_2, window_bounds = array<i64: 1, 64>}, {transform_indices = @transform_3, window_bounds = array<i64: 2, 72, 64>}]} {
    %c0_i32 = arith.constant 0 : i32
    %0 = arith.cmpi eq, %arg2, %c0_i32 : i32
    %1 = arith.extui %0 : i1 to i32
    %c0_i32_0 = arith.constant 0 : i32
    %2 = arith.cmpi ne, %1, %c0_i32_0 : i32
    scf.if %2 {
      %cst_79 = arith.constant 0.000000e+00 : f32
      %64 = vector.broadcast %cst_79 : f32 to vector<2x72x64xf32>
      %c0_80 = arith.constant 0 : index
      %c0_81 = arith.constant 0 : index
      %c0_82 = arith.constant 0 : index
      %65 = vector.load %arg7[%c0_80, %c0_81, %c0_82] : memref<2x72x64xf32, #tpu.memory_space<vmem>>, vector<2x72x64xf32>
      tpu.vector_store %arg7[%c0_80, %c0_81, %c0_82], %64 {strides = array<i32>} : memref<2x72x64xf32, #tpu.memory_space<vmem>>, vector<2x72x64xf32>,
    } else {
    }
    %c0 = arith.constant 0 : index
    %c0_1 = arith.constant 0 : index
    %c0_2 = arith.constant 0 : index
    %c0_3 = arith.constant 0 : index
    %3 = vector.load %arg3[%c0, %c0_1, %c0_2, %c0_3] : memref<1x2x88x3xbf16, #tpu.memory_space<vmem>>, vector<1x1x72x3xbf16>
    %4 = vector.shape_cast %3 : vector<1x1x72x3xbf16> to vector<72x3xbf16>
    %c0_4 = arith.constant 0 : index
    %c0_5 = arith.constant 0 : index
    %c0_6 = arith.constant 0 : index
    %c0_7 = arith.constant 0 : index
    %5 = vector.load %arg4[%c0_4, %c0_5, %c0_6, %c0_7] : memref<1x4x3x64xbf16, #tpu.memory_space<vmem>>, vector<1x1x3x64xbf16>
    %6 = vector.shape_cast %5 : vector<1x1x3x64xbf16> to vector<3x64xbf16>
    %cst = arith.constant dense<0.000000e+00> : vector<72x64xf32>
    %7 = tpu.matmul %4, %6, %cst {dimension_numbers = #tpu.dot_dimension_numbers<[1], [0], [0], [1], [0, 0, 1, 1], [], []>} : vector<72x3xbf16>, vector<3x64xbf16>, vector<72x64xf32> -> vector<72x64xf32>
    %c0_8 = arith.constant 0 : index
    %c0_9 = arith.constant 0 : index
    %c1 = arith.constant 1 : index
    %c0_10 = arith.constant 0 : index
    %8 = vector.load %arg3[%c0_8, %c0_9, %c1, %c0_10] : memref<1x2x88x3xbf16, #tpu.memory_space<vmem>>, vector<1x1x72x3xbf16>
    %9 = vector.shape_cast %8 : vector<1x1x72x3xbf16> to vector<72x3xbf16>
    %c0_11 = arith.constant 0 : index
    %c1_12 = arith.constant 1 : index
    %c0_13 = arith.constant 0 : index
    %c0_14 = arith.constant 0 : index
    %10 = vector.load %arg4[%c0_11, %c1_12, %c0_13, %c0_14] : memref<1x4x3x64xbf16, #tpu.memory_space<vmem>>, vector<1x1x3x64xbf16>
    %11 = vector.shape_cast %10 : vector<1x1x3x64xbf16> to vector<3x64xbf16>
    %cst_15 = arith.constant dense<0.000000e+00> : vector<72x64xf32>
    %12 = tpu.matmul %9, %11, %cst_15 {dimension_numbers = #tpu.dot_dimension_numbers<[1], [0], [0], [1], [0, 0, 1, 1], [], []>} : vector<72x3xbf16>, vector<3x64xbf16>, vector<72x64xf32> -> vector<72x64xf32>
    %13 = arith.addf %7, %12 : vector<72x64xf32>
    %c0_16 = arith.constant 0 : index
    %c0_17 = arith.constant 0 : index
    %c9 = arith.constant 9 : index
    %c0_18 = arith.constant 0 : index
    %14 = vector.load %arg3[%c0_16, %c0_17, %c9, %c0_18] : memref<1x2x88x3xbf16, #tpu.memory_space<vmem>>, vector<1x1x72x3xbf16>
    %15 = vector.shape_cast %14 : vector<1x1x72x3xbf16> to vector<72x3xbf16>
    %c0_19 = arith.constant 0 : index
    %c2 = arith.constant 2 : index
    %c0_20 = arith.constant 0 : index
    %c0_21 = arith.constant 0 : index
    %16 = vector.load %arg4[%c0_19, %c2, %c0_20, %c0_21] : memref<1x4x3x64xbf16, #tpu.memory_space<vmem>>, vector<1x1x3x64xbf16>
    %17 = vector.shape_cast %16 : vector<1x1x3x64xbf16> to vector<3x64xbf16>
    %cst_22 = arith.constant dense<0.000000e+00> : vector<72x64xf32>
    %18 = tpu.matmul %15, %17, %cst_22 {dimension_numbers = #tpu.dot_dimension_numbers<[1], [0], [0], [1], [0, 0, 1, 1], [], []>} : vector<72x3xbf16>, vector<3x64xbf16>, vector<72x64xf32> -> vector<72x64xf32>
    %19 = arith.addf %13, %18 : vector<72x64xf32>
    %c0_23 = arith.constant 0 : index
    %c0_24 = arith.constant 0 : index
    %c10 = arith.constant 10 : index
    %c0_25 = arith.constant 0 : index
    %20 = vector.load %arg3[%c0_23, %c0_24, %c10, %c0_25] : memref<1x2x88x3xbf16, #tpu.memory_space<vmem>>, vector<1x1x72x3xbf16>
    %21 = vector.shape_cast %20 : vector<1x1x72x3xbf16> to vector<72x3xbf16>
    %c0_26 = arith.constant 0 : index
    %c3 = arith.constant 3 : index
    %c0_27 = arith.constant 0 : index
    %c0_28 = arith.constant 0 : index
    %22 = vector.load %arg4[%c0_26, %c3, %c0_27, %c0_28] : memref<1x4x3x64xbf16, #tpu.memory_space<vmem>>, vector<1x1x3x64xbf16>
    %23 = vector.shape_cast %22 : vector<1x1x3x64xbf16> to vector<3x64xbf16>
    %cst_29 = arith.constant dense<0.000000e+00> : vector<72x64xf32>
    %24 = tpu.matmul %21, %23, %cst_29 {dimension_numbers = #tpu.dot_dimension_numbers<[1], [0], [0], [1], [0, 0, 1, 1], [], []>} : vector<72x3xbf16>, vector<3x64xbf16>, vector<72x64xf32> -> vector<72x64xf32>
    %25 = arith.addf %19, %24 : vector<72x64xf32>
    %c0_30 = arith.constant 0 : index
    %c0_31 = arith.constant 0 : index
    %c0_32 = arith.constant 0 : index
    %26 = vector.load %arg7[%c0_30, %c0_31, %c0_32] : memref<2x72x64xf32, #tpu.memory_space<vmem>>, vector<1x72x64xf32>
    %27 = vector.shape_cast %26 : vector<1x72x64xf32> to vector<72x64xf32>
    %28 = arith.addf %27, %25 : vector<72x64xf32>
    %c0_33 = arith.constant 0 : index
    %c0_34 = arith.constant 0 : index
    %c0_35 = arith.constant 0 : index
    %29 = vector.load %arg7[%c0_33, %c0_34, %c0_35] : memref<2x72x64xf32, #tpu.memory_space<vmem>>, vector<1x72x64xf32>
    %30 = vector.shape_cast %29 : vector<1x72x64xf32> to vector<72x64xf32>
    %31 = vector.shape_cast %28 : vector<72x64xf32> to vector<1x72x64xf32>
    tpu.vector_store %arg7[%c0_33, %c0_34, %c0_35], %31 {strides = array<i32>} : memref<2x72x64xf32, #tpu.memory_space<vmem>>, vector<1x72x64xf32>,
    %c0_36 = arith.constant 0 : index
    %c1_37 = arith.constant 1 : index
    %c0_38 = arith.constant 0 : index
    %c0_39 = arith.constant 0 : index
    %32 = vector.load %arg3[%c0_36, %c1_37, %c0_38, %c0_39] : memref<1x2x88x3xbf16, #tpu.memory_space<vmem>>, vector<1x1x72x3xbf16>
    %33 = vector.shape_cast %32 : vector<1x1x72x3xbf16> to vector<72x3xbf16>
    %c0_40 = arith.constant 0 : index
    %c0_41 = arith.constant 0 : index
    %c0_42 = arith.constant 0 : index
    %c0_43 = arith.constant 0 : index
    %34 = vector.load %arg4[%c0_40, %c0_41, %c0_42, %c0_43] : memref<1x4x3x64xbf16, #tpu.memory_space<vmem>>, vector<1x1x3x64xbf16>
    %35 = vector.shape_cast %34 : vector<1x1x3x64xbf16> to vector<3x64xbf16>
    %cst_44 = arith.constant dense<0.000000e+00> : vector<72x64xf32>
    %36 = tpu.matmul %33, %35, %cst_44 {dimension_numbers = #tpu.dot_dimension_numbers<[1], [0], [0], [1], [0, 0, 1, 1], [], []>} : vector<72x3xbf16>, vector<3x64xbf16>, vector<72x64xf32> -> vector<72x64xf32>
    %c0_45 = arith.constant 0 : index
    %c1_46 = arith.constant 1 : index
    %c1_47 = arith.constant 1 : index
    %c0_48 = arith.constant 0 : index
    %37 = vector.load %arg3[%c0_45, %c1_46, %c1_47, %c0_48] : memref<1x2x88x3xbf16, #tpu.memory_space<vmem>>, vector<1x1x72x3xbf16>
    %38 = vector.shape_cast %37 : vector<1x1x72x3xbf16> to vector<72x3xbf16>
    %c0_49 = arith.constant 0 : index
    %c1_50 = arith.constant 1 : index
    %c0_51 = arith.constant 0 : index
    %c0_52 = arith.constant 0 : index
    %39 = vector.load %arg4[%c0_49, %c1_50, %c0_51, %c0_52] : memref<1x4x3x64xbf16, #tpu.memory_space<vmem>>, vector<1x1x3x64xbf16>
    %40 = vector.shape_cast %39 : vector<1x1x3x64xbf16> to vector<3x64xbf16>
    %cst_53 = arith.constant dense<0.000000e+00> : vector<72x64xf32>
    %41 = tpu.matmul %38, %40, %cst_53 {dimension_numbers = #tpu.dot_dimension_numbers<[1], [0], [0], [1], [0, 0, 1, 1], [], []>} : vector<72x3xbf16>, vector<3x64xbf16>, vector<72x64xf32> -> vector<72x64xf32>
    %42 = arith.addf %36, %41 : vector<72x64xf32>
    %c0_54 = arith.constant 0 : index
    %c1_55 = arith.constant 1 : index
    %c9_56 = arith.constant 9 : index
    %c0_57 = arith.constant 0 : index
    %43 = vector.load %arg3[%c0_54, %c1_55, %c9_56, %c0_57] : memref<1x2x88x3xbf16, #tpu.memory_space<vmem>>, vector<1x1x72x3xbf16>
    %44 = vector.shape_cast %43 : vector<1x1x72x3xbf16> to vector<72x3xbf16>
    %c0_58 = arith.constant 0 : index
    %c2_59 = arith.constant 2 : index
    %c0_60 = arith.constant 0 : index
    %c0_61 = arith.constant 0 : index
    %45 = vector.load %arg4[%c0_58, %c2_59, %c0_60, %c0_61] : memref<1x4x3x64xbf16, #tpu.memory_space<vmem>>, vector<1x1x3x64xbf16>
    %46 = vector.shape_cast %45 : vector<1x1x3x64xbf16> to vector<3x64xbf16>
    %cst_62 = arith.constant dense<0.000000e+00> : vector<72x64xf32>
    %47 = tpu.matmul %44, %46, %cst_62 {dimension_numbers = #tpu.dot_dimension_numbers<[1], [0], [0], [1], [0, 0, 1, 1], [], []>} : vector<72x3xbf16>, vector<3x64xbf16>, vector<72x64xf32> -> vector<72x64xf32>
    %48 = arith.addf %42, %47 : vector<72x64xf32>
    %c0_63 = arith.constant 0 : index
    %c1_64 = arith.constant 1 : index
    %c10_65 = arith.constant 10 : index
    %c0_66 = arith.constant 0 : index
    %49 = vector.load %arg3[%c0_63, %c1_64, %c10_65, %c0_66] : memref<1x2x88x3xbf16, #tpu.memory_space<vmem>>, vector<1x1x72x3xbf16>
    %50 = vector.shape_cast %49 : vector<1x1x72x3xbf16> to vector<72x3xbf16>
    %c0_67 = arith.constant 0 : index
    %c3_68 = arith.constant 3 : index
    %c0_69 = arith.constant 0 : index
    %c0_70 = arith.constant 0 : index
    %51 = vector.load %arg4[%c0_67, %c3_68, %c0_69, %c0_70] : memref<1x4x3x64xbf16, #tpu.memory_space<vmem>>, vector<1x1x3x64xbf16>
    %52 = vector.shape_cast %51 : vector<1x1x3x64xbf16> to vector<3x64xbf16>
    %cst_71 = arith.constant dense<0.000000e+00> : vector<72x64xf32>
    %53 = tpu.matmul %50, %52, %cst_71 {dimension_numbers = #tpu.dot_dimension_numbers<[1], [0], [0], [1], [0, 0, 1, 1], [], []>} : vector<72x3xbf16>, vector<3x64xbf16>, vector<72x64xf32> -> vector<72x64xf32>
    %54 = arith.addf %48, %53 : vector<72x64xf32>
    %c1_72 = arith.constant 1 : index
    %c0_73 = arith.constant 0 : index
    %c0_74 = arith.constant 0 : index
    %55 = vector.load %arg7[%c1_72, %c0_73, %c0_74] : memref<2x72x64xf32, #tpu.memory_space<vmem>>, vector<1x72x64xf32>
    %56 = vector.shape_cast %55 : vector<1x72x64xf32> to vector<72x64xf32>
    %57 = arith.addf %56, %54 : vector<72x64xf32>
    %c1_75 = arith.constant 1 : index
    %c0_76 = arith.constant 0 : index
    %c0_77 = arith.constant 0 : index
    %58 = vector.load %arg7[%c1_75, %c0_76, %c0_77] : memref<2x72x64xf32, #tpu.memory_space<vmem>>, vector<1x72x64xf32>
    %59 = vector.shape_cast %58 : vector<1x72x64xf32> to vector<72x64xf32>
    %60 = vector.shape_cast %57 : vector<72x64xf32> to vector<1x72x64xf32>
    tpu.vector_store %arg7[%c1_75, %c0_76, %c0_77], %60 {strides = array<i32>} : memref<2x72x64xf32, #tpu.memory_space<vmem>>, vector<1x72x64xf32>,
    %c3_i32 = arith.constant 3 : i32
    %61 = arith.cmpi eq, %arg2, %c3_i32 : i32
    %62 = arith.extui %61 : i1 to i32
    %c0_i32_78 = arith.constant 0 : i32
    %63 = arith.cmpi ne, %62, %c0_i32_78 : i32
    scf.if %63 {
      %c0_79 = arith.constant 0 : index
      %c0_80 = arith.constant 0 : index
      %c0_81 = arith.constant 0 : index
      %64 = vector.load %arg7[%c0_79, %c0_80, %c0_81] : memref<2x72x64xf32, #tpu.memory_space<vmem>>, vector<2x72x64xf32>
      %c0_82 = arith.constant 0 : index
      %c0_83 = arith.constant 0 : index
      %65 = vector.load %arg5[%c0_82, %c0_83] : memref<1x64xf32, #tpu.memory_space<vmem>>, vector<1x64xf32>
      %66 = vector.shape_cast %65 : vector<1x64xf32> to vector<1x1x64xf32>
      %67 = vector.broadcast %66 : vector<1x1x64xf32> to vector<2x72x64xf32>
      %68 = arith.addf %64, %67 : vector<2x72x64xf32>
      %cst_84 = arith.constant 0.000000e+00 : f32
      %69 = vector.broadcast %cst_84 : f32 to vector<2x72x64xf32>
      %70 = arith.cmpf ogt, %68, %69 : vector<2x72x64xf32>
      %cst_85 = arith.constant 2.000000e-01 : f32
      %71 = vector.broadcast %cst_85 : f32 to vector<2x72x64xf32>
      %72 = arith.mulf %71, %68 : vector<2x72x64xf32>
      %73 = arith.select %70, %68, %72 : vector<2x72x64xi1>, vector<2x72x64xf32>
      %74 = arith.truncf %73 : vector<2x72x64xf32> to vector<2x72x64xbf16>
      %c0_86 = arith.constant 0 : index
      %c0_87 = arith.constant 0 : index
      %c0_88 = arith.constant 0 : index
      %75 = vector.load %arg6[%c0_86, %c0_87, %c0_88] : memref<2x72x64xbf16, #tpu.memory_space<vmem>>, vector<2x72x64xbf16>
      tpu.vector_store %arg6[%c0_86, %c0_87, %c0_88], %74 {strides = array<i32>} : memref<2x72x64xbf16, #tpu.memory_space<vmem>>, vector<2x72x64xbf16>,
    } else {
    }
    return
  }
  func.func @transform_0(%arg0: i32, %arg1: i32, %arg2: i32) -> (i32, i32, i32, i32) {
    %c0_i32 = arith.constant 0 : i32
    %c0_i32_0 = arith.constant 0 : i32
    %c0_i32_1 = arith.constant 0 : i32
    return %arg2, %arg0, %c0_i32, %c0_i32_0 : i32, i32, i32, i32
  }
  func.func @transform_1(%arg0: i32, %arg1: i32, %arg2: i32) -> (i32, i32, i32, i32) {
    %c0_i32 = arith.constant 0 : i32
    %c0_i32_0 = arith.constant 0 : i32
    %c0_i32_1 = arith.constant 0 : i32
    return %arg2, %c0_i32, %c0_i32_0, %arg1 : i32, i32, i32, i32
  }
  func.func @transform_2(%arg0: i32, %arg1: i32, %arg2: i32) -> (i32, i32) {
    %c0_i32 = arith.constant 0 : i32
    %c0_i32_0 = arith.constant 0 : i32
    return %c0_i32, %arg1 : i32, i32
  }
  func.func @transform_3(%arg0: i32, %arg1: i32, %arg2: i32) -> (i32, i32, i32) {
    %c0_i32 = arith.constant 0 : i32
    %c0_i32_0 = arith.constant 0 : i32
    return %arg0, %c0_i32, %arg1 : i32, i32, i32
  }
}

</mosaic_0001>

<bundles_post_ra>
// kernel: tpu_custom_call.1
= control target key start
LH: loop header
LB: loop body
LE: loop exit
PB: predicated region body
PF: predicated region fallthrough
CT: control target
= control target key end

     0   :  { %s1626_s12 = smov 0   ;;  %s1628_s13 = smov 0   ;;  %s1900_s0 = inlined_call_operand.vmem [shape: bf16[4,2,88,3], index: 0, kind: input, shape index: {}]   ;;  %s1901_s1 = inlined_call_operand.vmem [shape: bf16[4,4,3,64], index: 1, kind: input, shape index: {}]   ;;  %s1902_s2 = inlined_call_operand.vmem [shape: f32[1,64], index: 2, kind: input, shape index: {}]   ;;  %s1903_s3 = inlined_call_operand.vmem [shape: bf16[2,72,64], index: 3, kind: output, shape index: {}]  }
   0x1   :  { %s1630_s14 = smov 0  }
   0x2 LB: > { %s25_s15 = sadd.s32 1, %s1598_s13  ;;  %p1383_p0 = scmp.ge.s32.totalorder %s1602_s14, 1  ;;  %s1602_s14 = sphi %s1630_s14, %s13_s14   ;;  %s1598_s13 = sphi %s1628_s13, %s1905_s13   ;;  %s1594_s12 = sphi %s1626_s12, %s1904_s12  }
   0x3   : > { %p26_p1 = scmp.ge.s32.totalorder %s25_s15, 4  ;;  %p189_p2 = scmp.lt.s32.totalorder %s1602_s14, 5 }
   0x5   : > { %s1907_s15 = smov (%p26_p1, %s25_s15), 0  ;;  %p190_p3 = pnand %p1383_p0, %p189_p2 }
   0x6   : > { %p234_p4 = scmp.lt.s32.totalorder (!%p190_p3), %s1594_s12, 3  ;;  %p1387_p5 = scmp.ne.s32.totalorder (!%p190_p3), %s1594_s12, 0 }
   0x7   : > { %193 = sbr.rel (%p190_p3) target bundleno = 364 (0x16c), region = 32 }
   0xc   : > { %s235_s16 = scalar_select %p234_p4, %s1594_s12, 3 }
   0xd   : > { %269 = sbr.rel (%p1387_p5) target bundleno = 37 (0x25), region = 36 }
   0xe   : > { %s1549_s17 = smul.u32 88, %s235_s16  ;;  %s1524_s18 = sshll.u32 %s235_s16, 3 }
   0xf   : > { %s1651_s21 = scalar_lea.vmem %s1901_s1, %s1524_s18 }
  0x10   : > { %s1656_s24 = scalar_lea.vmem %s1900_s0, %s1549_s17 }
  0x12   : > { %vm270_vm0 = vcmask 523264   ;;  %v1604_v0 = vmov 0.0  }
  0x13   : > { %271 = vst.msk [vmem:[#allocation2] sm:$0xff] %vm270_vm0, %v1604_v0 }
  0x14   : > { %272 = vst.msk [vmem:[#allocation2 + $0x8] sm:$0xff] %vm270_vm0, %v1604_v0 }
  0x15   : > { %273 = vst.msk [vmem:[#allocation2 + $0x10] sm:$0xff] %vm270_vm0, %v1604_v0 }
  0x16   : > { %274 = vst.msk [vmem:[#allocation2 + $0x18] sm:$0xff] %vm270_vm0, %v1604_v0 }
  0x17   : > { %275 = vst.msk [vmem:[#allocation2 + $0x20] sm:$0xff] %vm270_vm0, %v1604_v0 }
  0x18   : > { %276 = vst.msk [vmem:[#allocation2 + $0x28] sm:$0xff] %vm270_vm0, %v1604_v0 }
  0x19   : > { %277 = vst.msk [vmem:[#allocation2 + $0x30] sm:$0xff] %vm270_vm0, %v1604_v0 }
  0x1a   : > { %278 = vst.msk [vmem:[#allocation2 + $0x38] sm:$0xff] %vm270_vm0, %v1604_v0 }
  0x1b   : > { %279 = vst.msk [vmem:[#allocation2 + $0x40] sm:$0xff] %vm270_vm0, %v1604_v0 }
  0x1c   : > { %280 = vst.msk [vmem:[#allocation2 + $0x48] sm:$0xff] %vm270_vm0, %v1604_v0 }
  0x1d   : > { %281 = vst.msk [vmem:[#allocation2 + $0x50] sm:$0xff] %vm270_vm0, %v1604_v0 }
  0x1e   : > { %282 = vst.msk [vmem:[#allocation2 + $0x58] sm:$0xff] %vm270_vm0, %v1604_v0 }
  0x1f   : > { %283 = vst.msk [vmem:[#allocation2 + $0x60] sm:$0xff] %vm270_vm0, %v1604_v0 }
  0x20   : > { %284 = vst.msk [vmem:[#allocation2 + $0x68] sm:$0xff] %vm270_vm0, %v1604_v0 }
  0x21   : > { %285 = vst.msk [vmem:[#allocation2 + $0x70] sm:$0xff] %vm270_vm0, %v1604_v0 }
  0x22   : > { %286 = vst.msk [vmem:[#allocation2 + $0x78] sm:$0xff] %vm270_vm0, %v1604_v0 }
  0x23   : > { %287 = vst.msk [vmem:[#allocation2 + $0x80] sm:$0xff] %vm270_vm0, %v1604_v0 }
  0x24   : > { %288 = vst.msk [vmem:[#allocation2 + $0x88] sm:$0xff] %vm270_vm0, %v1604_v0 }
  0x25 PF: > { %vm383_vm1 = vcmask 1040384   ;;  %vm384_vm2 = vcmask 1041408   ;;  %v1437_v1 = vld [vmem:[%s1651_s21 + $0x6] sm:$0x3]  ;;  %vm367_vm3 = vcmask 23552   ;;  %v1605_v2 = vmov 65535  }
  0x26   : > { %v385_v3 = vsel %vm383_vm1, 4294967295, %v1605_v2  ;;  %v298_v4 = vld [vmem:[%s1651_s21] sm:$0x3]  ;;  %v1388_v5 = vld [vmem:[%s1651_s21 + $0x2] sm:$0x3]  ;;  %v472_v6 = vld [vmem:[%s1656_s24 + $0x4] sm:$0xff]  }
  0x27   : > { %v1589_v7 = vld [vmem:[%s1656_s24 + $0x4] sm:$0xf0]  ;;  %v386_v8 = vsel %vm384_vm2, %v385_v3, 0  ;;  %v1529_v9 = vld [vmem:[%s1656_s24 + $0xc] sm:$0xff]  ;;  %v1590_v10 = vld [vmem:[%s1656_s24 + $0x4] sm:$0xe] }
  0x28   : > { %vm613_vm4 = vcmask 1046528   ;;  %v1525_v11 = vld [vmem:[%s1656_s24] sm:$0xff]  ;;  %v639_v12 = vand.u32 %v1437_v1, %v386_v8  ;;  %v436_v13 = vand.u32 %v386_v8, %v298_v4  ;;  %v388_v14 = vand.u32 %v1388_v5, %v386_v8  ;;  %v1526_v16 = vld [vmem:[%s1656_s24 + $0x8] sm:$0xff]  ;;  %v1527_v43 = vld [vmem:[%s1656_s24 + $0x10] sm:$0xff]  ;;  %p1519_p6 = scmp.ne.s32.totalorder %s1594_s12, 3 }
  0x29   : > { %v1415_v15 = vld [vmem:[%s1651_s21 + $0x4] sm:$0x3]  ;;  %v615_v18 = vrot.slane %v1529_v9, 1  ;;  %v331_v19 = vshll.u32 %v1525_v11, 16  ;;  %vm327_vm5 = vsmask.f32 7424  ;;  %v1591_v22 = vor.u32 %v1590_v10, %v1589_v7 }
  0x2a   : > { %v1490_v17 = vld [vmem:[%s1651_s21 + $0x4] sm:$0x3]  ;;  %v563_v20 = vand.u32 %v1415_v15, %v386_v8  ;;  %v1513_v21 = vld [vmem:[%s1651_s21 + $0x6] sm:$0x3]  ;;  %648 = vmatpush.bf16.msra.mxu3 %v639_v12  ;;  %445 = vmatpush.bf16.msra.mxu1 %v436_v13  ;;  %v329_v23 = vshrl.u32 %v1525_v11, 16  ;;  %v336_v24 = vshll.u32 %v1526_v16, 16 }
  0x2b   : > { %v1453_v25 = vld [vmem:[%s1651_s21 + $0x2] sm:$0x3]  ;;  %v721_v26 = vld [vmem:[%s1651_s21] sm:$0x3]  ;;  %397 = vmatpush.bf16.msra.mxu0 %v388_v14  ;;  %v333_v27 = vrot.slane %v331_v19, 1  ;;  %v516_v28 = vshll.u32 %v1529_v9, 16  ;;  %v978_v29 = vand.u32 %v1490_v17, %v386_v8  ;;  %v1052_v30 = vand.u32 %v1513_v21, %v386_v8 }
  0x2c   : > { %572 = vmatpush.bf16.msra.mxu2 %v563_v20  ;;  %v614_v31 = vrot.slane %v1591_v22, 1  ;;  %v338_v32 = vrot.slane %v336_v24, 1  ;;  %v509_v33 = vshrl.u32 %v472_v6, 16  ;;  %v511_v34 = vshll.u32 %v472_v6, 16  ;;  %v1530_v45 = vld [vmem:[%s1656_s24 + $0x14] sm:$0xff]  ;;  %v1531_v59 = vld [vmem:[%s1656_s24 + $0x1c] sm:$0xff] }
  0x2d   : > { %1410 = vmatmul.msk.bf16.vlgmr.msra.gmra.mxu1 %vm367_vm3, %v1525_v11  ;;  %v334_v35 = vor.u32 %v333_v27, %v329_v23  ;;  %v804_v36 = vand.u32 %v1453_v25, %v386_v8  ;;  %v852_v37 = vand.u32 %v721_v26, %v386_v8  ;;  %v518_v40 = vrot.slane %v516_v28, 1  ;;  %v1528_v58 = vld [vmem:[%s1656_s24 + $0x18] sm:$0xff]  ;;  %v297_v3 = vld [vmem:[%s1656_s24 + $0x20] sm:$0xf]  ;;  %v299_v4 = vld [vmem:[%s1656_s24 + $0x24] sm:$0x1] }
  0x2e   : > { %v616_v38 = vsel %vm613_vm4, %v614_v31, %v615_v18  ;;  %v513_v39 = vrot.slane %v511_v34, 1  ;;  %1061 = vmatpush.bf16.msrb.mxu3 %v1052_v30  ;;  %v340_v46 = vshrl.u32 %v1526_v16, 16  ;;  %v344_v47 = vshll.u32 %v1527_v43, 16  ;;  %v1430_v12 = vld [vmem:[%s1656_s24 + $0x24] sm:$0xf] }
  0x2f   : > { %1438 = vmatmul.msk.bf16.vlgmr.msra.gmra.mxu3 %vm367_vm3, %v616_v38  ;;  %v339_v41 = vsel %vm327_vm5, %v334_v35, %v338_v32  ;;  %813 = vmatpush.bf16.msrb.mxu0 %v804_v36  ;;  %v617_v48 = vrot.slane %v1530_v45, 1  ;;  %v520_v49 = vshrl.u32 %v1529_v9, 16  ;;  %v524_v50 = vshll.u32 %v1530_v45, 16  ;;  %v1532_v13 = vld [vmem:[%s1656_s24 + $0x24] sm:$0x10]  ;;  %v1534_v36 = vld [vmem:[%s1656_s24 + $0x34] sm:$0xff] }
  0x30   : > { %987 = vmatpush.bf16.msrb.mxu2 %v978_v29  ;;  %1405 = vmatmul.msk.bf16.vlgmr.msra.gmra.mxu0 %vm367_vm3, %v339_v41  ;;  %v514_v42 = vor.u32 %v513_v39, %v509_v33  ;;  %v342_v51 = vor.u32 %v340_v46, %v338_v32  ;;  %v346_v52 = vrot.slane %v344_v47, 1  ;;  %v348_v60 = vshrl.u32 %v1527_v43, 16  ;;  %v1533_v32 = vld [vmem:[%s1656_s24 + $0x2c] sm:$0xff]  ;;  %v1546_v34 = vld [vmem:[%s1656_s24 + $0x30] sm:$0xf0]  ;;  %v1537_v39 = vld [vmem:[%s1656_s24 + $0x38] sm:$0xff] }
  0x31   : > { %861 = vmatpush.bf16.msrb.mxu1 %v852_v37  ;;  %v618_v53 = vsel %vm613_vm4, %v615_v18, %v617_v48  ;;  %v522_v54 = vor.u32 %v520_v49, %v518_v40  ;;  %v526_v55 = vrot.slane %v524_v50, 1  ;;  %v352_v61 = vshll.u32 %v1528_v58, 16  ;;  %v1547_v35 = vld [vmem:[%s1656_s24 + $0x30] sm:$0xe] }
  0x32   : > { %v519_v44 = vsel %vm327_vm5, %v514_v42, %v518_v40  ;;  %v347_v56 = vsel %vm327_vm5, %v342_v51, %v346_v52  ;;  %v619_v62 = vrot.slane %v1531_v59, 1  ;;  %v528_v63 = vshrl.u32 %v1530_v45, 16  ;;  %v1545_v38 = vld [vmem:[%s1656_s24 + $0x30] sm:$0xff]  }
  0x33   : > { %1432 = vmatmul.msk.bf16.vlgmr.msra.gmra.mxu2 %vm367_vm3, %v519_v44  ;;  %v527_v57 = vsel %vm327_vm5, %v522_v54, %v526_v55  ;;  %v532_v0 = vshll.u32 %v1531_v59, 16  ;;  %v350_v1 = vor.u32 %v348_v60, %v346_v52  ;;  %v354_v2 = vrot.slane %v352_v61, 1 }
  0x34   : > { %v620_v5 = vsel %vm613_vm4, %v617_v48, %v619_v62  ;;  %v530_v6 = vor.u32 %v528_v63, %v526_v55  ;;  %v320_v9 = vunpack.c.l.b16 %v297_v3  ;;  %v321_v10 = vunpack.c.l.b16 %v299_v4 }
  0x35   : > { %v534_v7 = vrot.slane %v532_v0, 1  ;;  %v355_v8 = vsel %vm327_vm5, %v350_v1, %v354_v2  ;;  %v1431_v15 = vor.u32 %v1532_v13, %v1430_v12  ;;  %v536_v19 = vshrl.u32 %v1531_v59, 16 }
  0x36   : > { %v326_v14 = vpack.c.b16 %v321_v10, %v320_v9  ;;  %v423_v29 = vpack.c.b16 %v320_v9, %v320_v9  ;;  %v752_v37 = vshll.u32 %v1533_v32, 16  ;;  %v1548_v40 = vor.u32 %v1547_v35, %v1546_v34 }
  0x37   : > { %v535_v11 = vsel %vm327_vm5, %v530_v6, %v534_v7  ;;  %v621_v18 = vrot.slane %v1431_v15, 1  ;;  %v540_v20 = vshll.u32 %v1431_v15, 16  ;;  %v538_v24 = vor.u32 %v536_v19, %v534_v7  ;;  %v1536_v7 = vld [vmem:[%s1656_s24 + $0x44] sm:$0xff] }
  0x38   : > { %v360_v17 = vshll.u32 %v326_v14, 16  ;;  %v364_v28 = vshrl.u32 %v326_v14, 16  ;;  %v544_v30 = vshrl.u32 %v1431_v15, 16  ;;  %v926_v41 = vshll.u32 %v1545_v38, 16 }
  0x39   : > { %v622_v23 = vsel %vm613_vm4, %v619_v62, %v621_v18  ;;  %v542_v25 = vrot.slane %v540_v20, 1  ;;  %v750_v42 = vshrl.u32 %v1533_v32, 16  ;;  %v757_v44 = vshll.u32 %v1534_v36, 16 }
  0x3a   : > { %v362_v22 = vrot.slane %v360_v17, 1  ;;  %v1028_v45 = vrot.slane %v1537_v39, 1  ;;  %v1027_v46 = vrot.slane %v1548_v40, 1  ;;  %v924_v47 = vshrl.u32 %v1545_v38, 16  ;;  %v1452_v17 = vld [vmem:[%s1656_s24 + $0x50] sm:$0x1] }
  0x3b   : > { %v543_v27 = vsel %vm327_vm5, %v538_v24, %v542_v25  ;;  %v546_v33 = vor.u32 %v544_v30, %v542_v25  ;;  %v928_v48 = vrot.slane %v926_v41, 1  ;;  %v931_v49 = vshll.u32 %v1537_v39, 16  ;;  %v1505_v25 = vld [vmem:[%s1656_s24 + $0x50] sm:$0xf] }
  0x3c   : > { %v366_v31 = vor.u32 %v364_v28, %v362_v22  ;;  %v759_v51 = vrot.slane %v757_v44, 1  ;;  %v1029_v52 = vsel %vm613_vm4, %v1027_v46, %v1028_v45  ;;  %v761_v59 = vshrl.u32 %v1534_v36, 16 }
  0x3d   : > { %1411 = vmatmul.msk.bf16.gmra.mxu1 %vm367_vm3, %v1526_v16  ;;  %v356_v16 = vshrl.u32 %v1528_v58, 16  ;;  %v933_v54 = vrot.slane %v931_v49, 1  ;;  %v935_v62 = vshrl.u32 %v1537_v39, 16  ;;  %v773_v10 = vshll.u32 %v1536_v7, 16  ;;  %v683_v49 = vld [vmem:[#allocation2] sm:$0xff] }
  0x3e   : > { %v763_v0 = vor.u32 %v761_v59, %v759_v51  ;;  %vm701_vm6 = vcmask 523264  }
  0x3f   : > { %1439 = vmatmul.msk.bf16.gmra.mxu3 %vm367_vm3, %v618_v53  ;;  %v358_v21 = vor.u32 %v356_v16, %v354_v2  ;;  %v929_v53 = vor.u32 %v928_v48, %v924_v47  ;;  %v937_v3 = vor.u32 %v935_v62, %v933_v54  ;;  %v775_v15 = vrot.slane %v773_v10, 1  ;;  %v1451_v16 = vld [vmem:[%s1656_s24 + $0x4c] sm:$0xf] }
  0x40   : > { %1406 = vmatmul.msk.bf16.gmra.mxu0 %vm367_vm3, %v347_v56 }
  0x41   : > { %v363_v26 = vsel %vm327_vm5, %v358_v21, %v362_v22  ;;  %v934_v56 = vsel %vm327_vm5, %v929_v53, %v933_v54  ;;  %v742_v22 = vunpack.c.l.b16 %v1451_v16 }
  0x43   : > { %1433 = vmatmul.msk.bf16.gmra.mxu2 %vm367_vm3, %v527_v57  ;;  %v1535_v57 = vld [vmem:[%s1656_s24 + $0x3c] sm:$0xff] }
  0x44   : > { %v765_v60 = vshll.u32 %v1535_v57, 16  ;;  %v769_v9 = vshrl.u32 %v1535_v57, 16 }
  0x46   : > { %v767_v1 = vrot.slane %v765_v60, 1 }
  0x48   : > { %v771_v14 = vor.u32 %v769_v9, %v767_v1 }
  0x4a   : > { %v776_v21 = vsel %vm327_vm5, %v771_v14, %v775_v15 }
  0x4d   : > { %1412 = vmatmul.msk.bf16.gmra.mxu1 %vm367_vm3, %v1527_v43  ;;  %v754_v43 = vrot.slane %v752_v37, 1 }
  0x4f   : > { %1440 = vmatmul.msk.bf16.gmra.mxu3 %vm367_vm3, %v620_v5  ;;  %v755_v50 = vor.u32 %v754_v43, %v750_v42  ;;  %v768_v5 = vsel %vm327_vm5, %v763_v0, %v767_v1 }
  0x50   : > { %1407 = vmatmul.msk.bf16.gmra.mxu0 %vm367_vm3, %v355_v8  ;;  %v1539_v8 = vld [vmem:[%s1656_s24 + $0x48] sm:$0xff] }
  0x51   : > { %v760_v55 = vsel %vm327_vm5, %v755_v50, %v759_v51  ;;  %v947_v13 = vshll.u32 %v1539_v8, 16 }
  0x53   : > { %1434 = vmatmul.msk.bf16.gmra.mxu2 %vm367_vm3, %v535_v11  ;;  %v1032_v11 = vrot.slane %v1539_v8, 1  ;;  %v949_v20 = vrot.slane %v947_v13, 1 }
  0x5d   : > { %1413 = vmatmul.msk.bf16.gmra.mxu1 %vm367_vm3, %v1528_v58  ;;  %v1538_v58 = vld [vmem:[%s1656_s24 + $0x40] sm:$0xff] }
  0x5e   : > { %v1030_v61 = vrot.slane %v1538_v58, 1  ;;  %v939_v63 = vshll.u32 %v1538_v58, 16  ;;  %v943_v12 = vshrl.u32 %v1538_v58, 16 }
  0x5f   : > { %1441 = vmatmul.msk.bf16.gmra.mxu3 %vm367_vm3, %v622_v23  ;;  %v743_v23 = vunpack.c.l.b16 %v1452_v17  ;;  %v686_v17 = vld [vmem:[#allocation2 + $0x18] sm:$0xff] }
  0x60   : > { %1408 = vmatmul.msk.bf16.gmra.mxu0 %vm367_vm3, %v363_v26  ;;  %v1031_v2 = vsel %vm613_vm4, %v1028_v45, %v1030_v61  ;;  %v941_v4 = vrot.slane %v939_v63, 1  ;;  %v1540_v26 = vld [vmem:[%s1656_s24 + $0x50] sm:$0x10]  ;;  %v684_v63 = vld [vmem:[#allocation2 + $0x8] sm:$0xff] }
  0x61   : > { %v1506_v28 = vor.u32 %v1540_v26, %v1505_v25  ;;  %v687_v26 = vld [vmem:[#allocation2 + $0x20] sm:$0xff] }
  0x62   : > { %v942_v6 = vsel %vm327_vm5, %v937_v3, %v941_v4  ;;  %v945_v19 = vor.u32 %v943_v12, %v941_v4 }
  0x63   : > { %1435 = vmatmul.msk.bf16.gmra.mxu2 %vm367_vm3, %v543_v27  ;;  %v748_v27 = vpack.c.b16 %v743_v23, %v742_v22 }
  0x64   : > { %v950_v24 = vsel %vm327_vm5, %v945_v19, %v949_v20 }
  0x65   : > { %v781_v30 = vshll.u32 %v748_v27, 16  ;;  %v785_v50 = vshrl.u32 %v748_v27, 16 }
  0x67   : > { %v783_v35 = vrot.slane %v781_v30, 1 }
  0x6d   : > { %1414 = vmatmul.msk.bf16.gmra.mxu1 %vm367_vm3, %v423_v29  ;;  %v777_v29 = vshrl.u32 %v1536_v7, 16 }
  0x6f   : > { %1442 = vmatmul.msk.bf16.gmra.mxu3 %vm367_vm3, %v621_v18  ;;  %v1033_v18 = vsel %vm613_vm4, %v1030_v61, %v1032_v11  ;;  %v779_v34 = vor.u32 %v777_v29, %v775_v15 }
  0x70   : > { %1409 = vmatmul.msk.bf16.gmra.mxu0 %vm367_vm3, %v366_v31  ;;  %v1034_v31 = vrot.slane %v1506_v28, 1 }
  0x71   : > { %v784_v41 = vsel %vm327_vm5, %v779_v34, %v783_v35 }
  0x72   : > { %v1035_v37 = vsel %vm613_vm4, %v1032_v11, %v1034_v31 }
  0x73   : > { %1436 = vmatmul.msk.bf16.gmra.mxu2 %vm367_vm3, %v546_v33  ;;  %v955_v33 = vshll.u32 %v1506_v28, 16 }
  0x75   : > { %v957_v39 = vrot.slane %v955_v33, 1 }
  0x7d   : > { %1475 = vmatmul.msk.bf16.vlgmr.msrb.gmra.mxu1 %vm367_vm3, %v1533_v32  ;;  %v951_v32 = vshrl.u32 %v1539_v8, 16  ;;  %v685_v8 = vld [vmem:[#allocation2 + $0x10] sm:$0xff] }
  0x7f   : > { %1514 = vmatmul.msk.bf16.vlgmr.msrb.gmra.mxu3 %vm367_vm3, %v1029_v52  ;;  %v953_v38 = vor.u32 %v951_v32, %v949_v20  ;;  %v839_v52 = vpack.c.b16 %v742_v22, %v742_v22 }
  0x80   : > { %1470 = vmatmul.msk.bf16.vlgmr.msrb.gmra.mxu0 %vm367_vm3, %v760_v55 }
  0x81   : > { %v958_v42 = vsel %vm327_vm5, %v953_v38, %v957_v39 }
  0x83   : > { %1507 = vmatmul.msk.bf16.vlgmr.msrb.gmra.mxu2 %vm367_vm3, %v934_v56  ;;  %v959_v56 = vshrl.u32 %v1506_v28, 16 }
  0x85   : > { %v961_v62 = vor.u32 %v959_v56, %v957_v39 }
  0x8d   : > { %1476 = vmatmul.msk.bf16.gmra.mxu1 %vm367_vm3, %v1534_v36 }
  0x8f   : > { %1515 = vmatmul.msk.bf16.gmra.mxu3 %vm367_vm3, %v1031_v2 }
  0x90   : > { %1471 = vmatmul.msk.bf16.gmra.mxu0 %vm367_vm3, %v768_v5 }
  0x93   : > { %1508 = vmatmul.msk.bf16.gmra.mxu2 %vm367_vm3, %v942_v6 }
  0x9d   : > { %1477 = vmatmul.msk.bf16.gmra.mxu1 %vm367_vm3, %v1535_v57  ;;  %v787_v57 = vor.u32 %v785_v50, %v783_v35  ;;  %v688_v35 = vld [vmem:[#allocation2 + $0x28] sm:$0xff] }
  0x9f   : > { %1516 = vmatmul.msk.bf16.gmra.mxu3 %vm367_vm3, %v1033_v18 }
  0xa0   : > { %1472 = vmatmul.msk.bf16.gmra.mxu0 %vm367_vm3, %v776_v21 }
  0xa3   : > { %1509 = vmatmul.msk.bf16.gmra.mxu2 %vm367_vm3, %v950_v24 }
  0xaa   : > { %v447_v36 = vpop.f32.mrf.mxu1 }
  0xad   : > { %v399_v40 = vpop.f32.mrf.mxu0  ;;  %1478 = vmatmul.msk.bf16.gmra.mxu1 %vm367_vm3, %v1536_v7 }
  0xae   : > { %v448_v45 = vadd.f32 %v447_v36, %v399_v40 }
  0xaf   : > { %1517 = vmatmul.msk.bf16.gmra.mxu3 %vm367_vm3, %v1035_v37 }
  0xb0   : > { %1473 = vmatmul.msk.bf16.gmra.mxu0 %vm367_vm3, %v784_v41 }
  0xb2   : > { %v650_v43 = vpop.f32.mrf.mxu3  ;;  %v449_v44 = vpop.f32.mrf.mxu1 }
  0xb3   : > { %1510 = vmatmul.msk.bf16.gmra.mxu2 %vm367_vm3, %v958_v42 }
  0xb5   : > { %v401_v46 = vpop.f32.mrf.mxu0 }
  0xb6   : > { %v574_v47 = vpop.f32.mrf.mxu2  ;;  %v450_v58 = vadd.f32 %v449_v44, %v401_v46  ;;  %v689_v44 = vld [vmem:[#allocation2 + $0x30] sm:$0xff] }
  0xb7   : > { %v598_v48 = vadd.f32 %v574_v47, %v448_v45 }
  0xb9   : > { %v674_v51 = vadd.f32 %v650_v43, %v598_v48 }
  0xba   : > { %v652_v53 = vpop.f32.mrf.mxu3  ;;  %v452_v54 = vpop.f32.mrf.mxu1 }
  0xbb   : > { %v692_v55 = vadd.f32 %v683_v49, %v674_v51 }
  0xbd   : > { %702 = vst.msk [vmem:[#allocation2] sm:$0xff] %vm701_vm6, %v692_v55  ;;  %v404_v59 = vpop.f32.mrf.mxu0  ;;  %1479 = vmatmul.msk.bf16.gmra.mxu1 %vm367_vm3, %v839_v52 }
  0xbe   : > { %v576_v60 = vpop.f32.mrf.mxu2  ;;  %v453_v3 = vadd.f32 %v452_v54, %v404_v59 }
  0xbf   : > { %v599_v61 = vadd.f32 %v576_v60, %v450_v58  ;;  %1518 = vmatmul.msk.bf16.gmra.mxu3 %vm367_vm3, %v1034_v31 }
  0xc0   : > { %1474 = vmatmul.msk.bf16.gmra.mxu0 %vm367_vm3, %v787_v57 }
  0xc1   : > { %v675_v0 = vadd.f32 %v652_v53, %v599_v61  ;;  %v690_v53 = vld [vmem:[#allocation2 + $0x38] sm:$0xff] }
  0xc2   : > { %v655_v1 = vpop.f32.mrf.mxu3  ;;  %v454_v2 = vpop.f32.mrf.mxu1 }
  0xc3   : > { %v693_v4 = vadd.f32 %v684_v63, %v675_v0  ;;  %1511 = vmatmul.msk.bf16.gmra.mxu2 %vm367_vm3, %v961_v62  ;;  %v691_v62 = vld [vmem:[#allocation2 + $0x40] sm:$0xff] }
  0xc5   : > { %703 = vst.msk [vmem:[#allocation2 + $0x8] sm:$0xff] %vm701_vm6, %v693_v4  ;;  %v406_v5 = vpop.f32.mrf.mxu0 }
  0xc6   : > { %v579_v6 = vpop.f32.mrf.mxu2  ;;  %v455_v13 = vadd.f32 %v454_v2, %v406_v5 }
  0xc7   : > { %v600_v7 = vadd.f32 %v579_v6, %v453_v3 }
  0xc9   : > { %v676_v9 = vadd.f32 %v655_v1, %v600_v7 }
  0xca   : > { %v657_v10 = vpop.f32.mrf.mxu3  ;;  %v457_v11 = vpop.f32.mrf.mxu1 }
  0xcb   : > { %v694_v12 = vadd.f32 %v685_v8, %v676_v9 }
  0xcd   : > { %704 = vst.msk [vmem:[#allocation2 + $0x10] sm:$0xff] %vm701_vm6, %v694_v12  ;;  %v409_v14 = vpop.f32.mrf.mxu0 }
  0xce   : > { %v581_v15 = vpop.f32.mrf.mxu2  ;;  %v458_v21 = vadd.f32 %v457_v11, %v409_v14  ;;  %v1097_v11 = vld [vmem:[#allocation2 + $0x48] sm:$0xff] }
  0xcf   : > { %v601_v16 = vadd.f32 %v581_v15, %v455_v13 }
  0xd1   : > { %v677_v18 = vadd.f32 %v657_v10, %v601_v16 }
  0xd2   : > { %v660_v19 = vpop.f32.mrf.mxu3  ;;  %v459_v20 = vpop.f32.mrf.mxu1 }
  0xd3   : > { %v695_v22 = vadd.f32 %v686_v17, %v677_v18 }
  0xd5   : > { %705 = vst.msk [vmem:[#allocation2 + $0x18] sm:$0xff] %vm701_vm6, %v695_v22  ;;  %v411_v23 = vpop.f32.mrf.mxu0 }
  0xd6   : > { %v584_v24 = vpop.f32.mrf.mxu2  ;;  %v460_v31 = vadd.f32 %v459_v20, %v411_v23  ;;  %v1098_v20 = vld [vmem:[#allocation2 + $0x50] sm:$0xff] }
  0xd7   : > { %v602_v25 = vadd.f32 %v584_v24, %v458_v21 }
  0xd9   : > { %v678_v27 = vadd.f32 %v660_v19, %v602_v25 }
  0xda   : > { %v662_v28 = vpop.f32.mrf.mxu3  ;;  %v462_v29 = vpop.f32.mrf.mxu1 }
  0xdb   : > { %v696_v30 = vadd.f32 %v687_v26, %v678_v27 }
  0xdd   : > { %706 = vst.msk [vmem:[#allocation2 + $0x20] sm:$0xff] %vm701_vm6, %v696_v30  ;;  %v414_v32 = vpop.f32.mrf.mxu0 }
  0xde   : > { %v586_v33 = vpop.f32.mrf.mxu2  ;;  %v463_v39 = vadd.f32 %v462_v29, %v414_v32  ;;  %v1099_v29 = vld [vmem:[#allocation2 + $0x58] sm:$0xff] }
  0xdf   : > { %v603_v34 = vadd.f32 %v586_v33, %v460_v31 }
  0xe1   : > { %v679_v36 = vadd.f32 %v662_v28, %v603_v34 }
  0xe2   : > { %v665_v37 = vpop.f32.mrf.mxu3  ;;  %v464_v38 = vpop.f32.mrf.mxu1 }
  0xe3   : > { %v697_v40 = vadd.f32 %v688_v35, %v679_v36 }
  0xe5   : > { %707 = vst.msk [vmem:[#allocation2 + $0x28] sm:$0xff] %vm701_vm6, %v697_v40  ;;  %v416_v41 = vpop.f32.mrf.mxu0 }
  0xe6   : > { %v589_v42 = vpop.f32.mrf.mxu2  ;;  %v465_v49 = vadd.f32 %v464_v38, %v416_v41  ;;  %v1100_v38 = vld [vmem:[#allocation2 + $0x60] sm:$0xff] }
  0xe7   : > { %v604_v43 = vadd.f32 %v589_v42, %v463_v39 }
  0xe9   : > { %v680_v45 = vadd.f32 %v665_v37, %v604_v43 }
  0xea   : > { %v667_v46 = vpop.f32.mrf.mxu3  ;;  %v467_v47 = vpop.f32.mrf.mxu1 }
  0xeb   : > { %v698_v48 = vadd.f32 %v689_v44, %v680_v45 }
  0xed   : > { %708 = vst.msk [vmem:[#allocation2 + $0x30] sm:$0xff] %vm701_vm6, %v698_v48  ;;  %v419_v50 = vpop.f32.mrf.mxu0 }
  0xee   : > { %v591_v51 = vpop.f32.mrf.mxu2  ;;  %v468_v57 = vadd.f32 %v467_v47, %v419_v50  ;;  %v1101_v47 = vld [vmem:[#allocation2 + $0x68] sm:$0xff] }
  0xef   : > { %v605_v52 = vadd.f32 %v591_v51, %v465_v49 }
  0xf1   : > { %v681_v54 = vadd.f32 %v667_v46, %v605_v52 }
  0xf2   : > { %v670_v55 = vpop.f32.mrf.mxu3  ;;  %v469_v56 = vpop.f32.mrf.mxu1 }
  0xf3   : > { %v699_v58 = vadd.f32 %v690_v53, %v681_v54  ;;  %v1102_v56 = vld [vmem:[#allocation2 + $0x70] sm:$0xff] }
  0xf5   : > { %709 = vst.msk [vmem:[#allocation2 + $0x38] sm:$0xff] %vm701_vm6, %v699_v58  ;;  %v421_v59 = vpop.f32.mrf.mxu0 }
  0xf6   : > { %v594_v60 = vpop.f32.mrf.mxu2 }
  0xf7   : > { %v606_v61 = vadd.f32 %v594_v60, %v468_v57 }
  0xf9   : > { %v682_v63 = vadd.f32 %v670_v55, %v606_v61 }
  0xfa   : > { %v672_v0 = vpop.f32.mrf.mxu3  ;;  %v863_v1 = vpop.f32.mrf.mxu1 }
  0xfb   : > { %v700_v2 = vadd.f32 %v691_v62, %v682_v63 }
  0xfd   : > { %710 = vst.msk [vmem:[#allocation2 + $0x40] sm:$0xff] %vm701_vm6, %v700_v2  ;;  %v815_v3 = vpop.f32.mrf.mxu0 }
  0xfe   : > { %v596_v4 = vpop.f32.mrf.mxu2  ;;  %v864_v7 = vadd.f32 %v863_v1, %v815_v3  ;;  %v1103_v1 = vld [vmem:[#allocation2 + $0x78] sm:$0xff] }
 0x102   : > { %v1063_v5 = vpop.f32.mrf.mxu3  ;;  %v865_v6 = vpop.f32.mrf.mxu1 }
 0x105   : > { %v817_v8 = vpop.f32.mrf.mxu0 }
 0x106   : > { %v989_v9 = vpop.f32.mrf.mxu2  ;;  %v866_v16 = vadd.f32 %v865_v6, %v817_v8 }
 0x107   : > { %v1013_v10 = vadd.f32 %v989_v9, %v864_v7 }
 0x109   : > { %v1087_v12 = vadd.f32 %v1063_v5, %v1013_v10  ;;  %v1104_v10 = vld [vmem:[#allocation2 + $0x80] sm:$0xff] }
 0x10a   : > { %v1065_v13 = vpop.f32.mrf.mxu3  ;;  %v868_v14 = vpop.f32.mrf.mxu1 }
 0x10b   : > { %v1106_v15 = vadd.f32 %v1097_v11, %v1087_v12 }
 0x10d   : > { %1115 = vst.msk [vmem:[#allocation2 + $0x48] sm:$0xff] %vm701_vm6, %v1106_v15  ;;  %v820_v17 = vpop.f32.mrf.mxu0 }
 0x10e   : > { %v991_v18 = vpop.f32.mrf.mxu2  ;;  %v869_v24 = vadd.f32 %v868_v14, %v820_v17 }
 0x10f   : > { %v1014_v19 = vadd.f32 %v991_v18, %v866_v16 }
 0x111   : > { %v1088_v21 = vadd.f32 %v1065_v13, %v1014_v19  ;;  %v1105_v19 = vld [vmem:[#allocation2 + $0x88] sm:$0xff] }
 0x112   : > { %v1068_v22 = vpop.f32.mrf.mxu3  ;;  %v870_v23 = vpop.f32.mrf.mxu1 }
 0x113   : > { %v1107_v25 = vadd.f32 %v1098_v20, %v1088_v21 }
 0x115   : > { %1116 = vst.msk [vmem:[#allocation2 + $0x50] sm:$0xff] %vm701_vm6, %v1107_v25  ;;  %v822_v26 = vpop.f32.mrf.mxu0 }
 0x116   : > { %v994_v27 = vpop.f32.mrf.mxu2  ;;  %v871_v34 = vadd.f32 %v870_v23, %v822_v26 }
 0x117   : > { %v1015_v28 = vadd.f32 %v994_v27, %v869_v24 }
 0x119   : > { %v1089_v30 = vadd.f32 %v1068_v22, %v1015_v28 }
 0x11a   : > { %v1070_v31 = vpop.f32.mrf.mxu3  ;;  %v873_v32 = vpop.f32.mrf.mxu1 }
 0x11b   : > { %v1108_v33 = vadd.f32 %v1099_v29, %v1089_v30 }
 0x11d   : > { %1117 = vst.msk [vmem:[#allocation2 + $0x58] sm:$0xff] %vm701_vm6, %v1108_v33  ;;  %v825_v35 = vpop.f32.mrf.mxu0 }
 0x11e   : > { %v996_v36 = vpop.f32.mrf.mxu2  ;;  %v874_v42 = vadd.f32 %v873_v32, %v825_v35 }
 0x11f   : > { %v1016_v37 = vadd.f32 %v996_v36, %v871_v34 }
 0x121   : > { %v1090_v39 = vadd.f32 %v1070_v31, %v1016_v37 }
 0x122   : > { %v1073_v40 = vpop.f32.mrf.mxu3  ;;  %v875_v41 = vpop.f32.mrf.mxu1 }
 0x123   : > { %v1109_v43 = vadd.f32 %v1100_v38, %v1090_v39 }
 0x125   : > { %1118 = vst.msk [vmem:[#allocation2 + $0x60] sm:$0xff] %vm701_vm6, %v1109_v43  ;;  %v827_v44 = vpop.f32.mrf.mxu0 }
 0x126   : > { %v999_v45 = vpop.f32.mrf.mxu2  ;;  %v876_v52 = vadd.f32 %v875_v41, %v827_v44 }
 0x127   : > { %v1017_v46 = vadd.f32 %v999_v45, %v874_v42 }
 0x129   : > { %v1091_v48 = vadd.f32 %v1073_v40, %v1017_v46 }
 0x12a   : > { %v1075_v49 = vpop.f32.mrf.mxu3  ;;  %v878_v50 = vpop.f32.mrf.mxu1 }
 0x12b   : > { %v1110_v51 = vadd.f32 %v1101_v47, %v1091_v48 }
 0x12d   : > { %1119 = vst.msk [vmem:[#allocation2 + $0x68] sm:$0xff] %vm701_vm6, %v1110_v51  ;;  %v830_v53 = vpop.f32.mrf.mxu0 }
 0x12e   : > { %v1001_v54 = vpop.f32.mrf.mxu2  ;;  %v879_v60 = vadd.f32 %v878_v50, %v830_v53 }
 0x12f   : > { %v1018_v55 = vadd.f32 %v1001_v54, %v876_v52 }
 0x131   : > { %v1092_v57 = vadd.f32 %v1075_v49, %v1018_v55 }
 0x132   : > { %v1078_v58 = vpop.f32.mrf.mxu3  ;;  %v880_v59 = vpop.f32.mrf.mxu1 }
 0x133   : > { %v1111_v61 = vadd.f32 %v1102_v56, %v1092_v57 }
 0x135   : > { %1120 = vst.msk [vmem:[#allocation2 + $0x70] sm:$0xff] %vm701_vm6, %v1111_v61  ;;  %v832_v62 = vpop.f32.mrf.mxu0 }
 0x136   : > { %v1004_v63 = vpop.f32.mrf.mxu2  ;;  %v881_v6 = vadd.f32 %v880_v59, %v832_v62 }
 0x137   : > { %v1019_v0 = vadd.f32 %v1004_v63, %v879_v60 }
 0x139   : > { %v1093_v2 = vadd.f32 %v1078_v58, %v1019_v0 }
 0x13a   : > { %v1080_v3 = vpop.f32.mrf.mxu3  ;;  %v883_v4 = vpop.f32.mrf.mxu1 }
 0x13b   : > { %v1112_v5 = vadd.f32 %v1103_v1, %v1093_v2 }
 0x13d   : > { %1121 = vst.msk [vmem:[#allocation2 + $0x78] sm:$0xff] %vm701_vm6, %v1112_v5  ;;  %v835_v7 = vpop.f32.mrf.mxu0 }
 0x13e   : > { %v1006_v8 = vpop.f32.mrf.mxu2  ;;  %v884_v14 = vadd.f32 %v883_v4, %v835_v7 }
 0x13f   : > { %v1020_v9 = vadd.f32 %v1006_v8, %v881_v6 }
 0x141   : > { %v1094_v11 = vadd.f32 %v1080_v3, %v1020_v9 }
 0x142   : > { %v1083_v12 = vpop.f32.mrf.mxu3  ;;  %v885_v13 = vpop.f32.mrf.mxu1 }
 0x143   : > { %v1113_v15 = vadd.f32 %v1104_v10, %v1094_v11 }
 0x145   : > { %1122 = vst.msk [vmem:[#allocation2 + $0x80] sm:$0xff] %vm701_vm6, %v1113_v15  ;;  %v837_v16 = vpop.f32.mrf.mxu0 }
 0x146   : > { %v1009_v17 = vpop.f32.mrf.mxu2 }
 0x147   : > { %v1021_v18 = vadd.f32 %v1009_v17, %v884_v14 }
 0x149   : > { %v1095_v20 = vadd.f32 %v1083_v12, %v1021_v18 }
 0x14a   : > { %v1085_v21 = vpop.f32.mrf.mxu3  ;;  %1127 = sbr.rel (%p1519_p6) target bundleno = 364 (0x16c), region = 40 }
 0x14b   : > { %v1114_v22 = vadd.f32 %v1105_v19, %v1095_v20 }
 0x14d   : > { %1123 = vst.msk [vmem:[#allocation2 + $0x88] sm:$0xff] %vm701_vm6, %v1114_v22 }
 0x14e   : > { %v1011_v23 = vpop.f32.mrf.mxu2 }
 0x14f   : > { %v1128_v24 = vld [vmem:[#allocation2] sm:$0xff]  ;;  %v1129_v26 = vld [vmem:[#allocation2 + $0x8] sm:$0xff]  ;;  %v1130_v27 = vld [vmem:[#allocation2 + $0x10] sm:$0xff]  ;;  %vm1240_vm7 = vcmask 519168  }
 0x150   : > { %v1799_v25 = vld [vmem:[%s1902_s2] ss:$0 sm:$0xff]  ;;  %v1131_v28 = vld [vmem:[#allocation2 + $0x18] sm:$0xff]  ;;  %v1133_v34 = vld [vmem:[#allocation2 + $0x28] sm:$0xff] }
 0x151   : > { %v1150_v29 = vadd.f32 %v1799_v25, %v1128_v24  ;;  %v1151_v30 = vadd.f32 %v1799_v25, %v1129_v26  ;;  %v1152_v31 = vadd.f32 %v1799_v25, %v1130_v27  ;;  %v1153_v32 = vadd.f32 %v1799_v25, %v1131_v28  ;;  %v1132_v33 = vld [vmem:[#allocation2 + $0x20] sm:$0xff]  ;;  %v1134_v35 = vld [vmem:[#allocation2 + $0x30] sm:$0xff]  ;;  %v1135_v46 = vld [vmem:[#allocation2 + $0x38] sm:$0xff] }
 0x152   : > { %v1154_v36 = vadd.f32 %v1799_v25, %v1132_v33  ;;  %v1155_v37 = vadd.f32 %v1799_v25, %v1133_v34  ;;  %v1156_v38 = vadd.f32 %v1799_v25, %v1134_v35  ;;  %v1136_v51 = vld [vmem:[#allocation2 + $0x40] sm:$0xff]  ;;  %v1137_v52 = vld [vmem:[#allocation2 + $0x48] sm:$0xff]  ;;  %v1138_v53 = vld [vmem:[#allocation2 + $0x50] sm:$0xff]  ;;  %v1157_v60 = vadd.f32 %v1799_v25, %v1135_v46 }
 0x153   : > { %vm1168_vm8 = vcmp.gt.f32.partialorder %v1150_v29, 0.0  ;;  %v1186_v39 = vmul.f32 0.2, %v1150_v29  ;;  %vm1169_vm9 = vcmp.gt.f32.partialorder %v1151_v30, 0.0  ;;  %v1187_v40 = vmul.f32 0.2, %v1151_v30 }
 0x154   : > { %vm1170_vm10 = vcmp.gt.f32.partialorder %v1152_v31, 0.0  ;;  %v1188_v41 = vmul.f32 0.2, %v1152_v31  ;;  %vm1171_vm11 = vcmp.gt.f32.partialorder %v1153_v32, 0.0  ;;  %v1189_v42 = vmul.f32 0.2, %v1153_v32 }
 0x155   : > { %v1204_v43 = vsel %vm1168_vm8, %v1150_v29, %v1186_v39  ;;  %v1205_v44 = vsel %vm1169_vm9, %v1151_v30, %v1187_v40  ;;  %vm1172_vm12 = vcmp.gt.f32.partialorder %v1154_v36, 0.0  ;;  %v1190_v45 = vmul.f32 0.2, %v1154_v36  ;;  %v1139_v57 = vld [vmem:[#allocation2 + $0x58] sm:$0xff]  ;;  %v1140_v4 = vld [vmem:[#allocation2 + $0x60] sm:$0xff]  ;;  %v1141_v8 = vld [vmem:[#allocation2 + $0x68] sm:$0xff] }
 0x156   : > { %v1222_v47 = vpack.c.bf16 %v1204_v43, %v1204_v43  ;;  %v1223_v48 = vpack.c.bf16 %v1205_v44, %v1205_v44  ;;  %v1206_v49 = vsel %vm1170_vm10, %v1152_v31, %v1188_v41  ;;  %v1207_v50 = vsel %vm1171_vm11, %v1153_v32, %v1189_v42  ;;  %v1142_v12 = vld [vmem:[#allocation2 + $0x70] sm:$0xff]  ;;  %v1143_v16 = vld [vmem:[#allocation2 + $0x78] sm:$0xff]  ;;  %v1144_v24 = vld [vmem:[#allocation2 + $0x80] sm:$0xff] }
 0x157   : > { %v1224_v54 = vpack.c.bf16 %v1206_v49, %v1206_v49  ;;  %v1225_v55 = vpack.c.bf16 %v1207_v50, %v1207_v50  ;;  %v1208_v56 = vsel %vm1172_vm12, %v1154_v36, %v1190_v45  ;;  %vm1173_vm13 = vcmp.gt.f32.partialorder %v1155_v37, 0.0  ;;  %v1145_v30 = vld [vmem:[#allocation2 + $0x88] sm:$0xff] }
 0x158   : > { %1241 = vst.msk [vmem:[%s1903_s3] sm:$0xf] %vm1240_vm7, %v1222_v47  ;;  %v1226_v58 = vpack.c.bf16 %v1208_v56, %v1208_v56  ;;  %v1191_v59 = vmul.f32 0.2, %v1155_v37  ;;  %vm1174_vm14 = vcmp.gt.f32.partialorder %v1156_v38, 0.0  ;;  %v1158_v62 = vadd.f32 %v1799_v25, %v1136_v51 }
 0x159   : > { %1242 = vst.msk [vmem:[%s1903_s3 + $0x4] sm:$0xf] %vm1240_vm7, %v1223_v48  ;;  %v1192_v61 = vmul.f32 0.2, %v1156_v38  ;;  %v1159_v63 = vadd.f32 %v1799_v25, %v1137_v52  ;;  %v1160_v0 = vadd.f32 %v1799_v25, %v1138_v53  ;;  %vm1175_vm15 = vcmp.gt.f32.partialorder %v1157_v60, 0.0 }
 0x15a   : > { %1243 = vst.msk [vmem:[%s1903_s3 + $0x8] sm:$0xf] %vm1240_vm7, %v1224_v54  ;;  %v1209_v1 = vsel %vm1173_vm13, %v1155_v37, %v1191_v59  ;;  %v1193_v2 = vmul.f32 0.2, %v1157_v60  ;;  %v1161_v3 = vadd.f32 %v1799_v25, %v1139_v57  ;;  %vm1176_vm0 = vcmp.gt.f32.partialorder %v1158_v62, 0.0 }
 0x15b   : > { %1244 = vst.msk [vmem:[%s1903_s3 + $0xc] sm:$0xf] %vm1240_vm7, %v1225_v55  ;;  %v1227_v5 = vpack.c.bf16 %v1209_v1, %v1209_v1  ;;  %v1210_v6 = vsel %vm1174_vm14, %v1156_v38, %v1192_v61  ;;  %v1194_v7 = vmul.f32 0.2, %v1158_v62  ;;  %vm1177_vm1 = vcmp.gt.f32.partialorder %v1159_v63, 0.0 }
 0x15c   : > { %1245 = vst.msk [vmem:[%s1903_s3 + $0x10] sm:$0xf] %vm1240_vm7, %v1226_v58  ;;  %v1228_v9 = vpack.c.bf16 %v1210_v6, %v1210_v6  ;;  %v1211_v10 = vsel %vm1175_vm15, %v1157_v60, %v1193_v2  ;;  %v1195_v11 = vmul.f32 0.2, %v1159_v63  ;;  %vm1178_vm2 = vcmp.gt.f32.partialorder %v1160_v0, 0.0 }
 0x15d   : > { %1246 = vst.msk [vmem:[%s1903_s3 + $0x14] sm:$0xf] %vm1240_vm7, %v1227_v5  ;;  %v1229_v13 = vpack.c.bf16 %v1211_v10, %v1211_v10  ;;  %v1212_v14 = vsel %vm1176_vm0, %v1158_v62, %v1194_v7  ;;  %v1196_v15 = vmul.f32 0.2, %v1160_v0  ;;  %vm1179_vm3 = vcmp.gt.f32.partialorder %v1161_v3, 0.0 }
 0x15e   : > { %1247 = vst.msk [vmem:[%s1903_s3 + $0x18] sm:$0xf] %vm1240_vm7, %v1228_v9  ;;  %v1230_v17 = vpack.c.bf16 %v1212_v14, %v1212_v14  ;;  %v1213_v18 = vsel %vm1177_vm1, %v1159_v63, %v1195_v11  ;;  %v1197_v19 = vmul.f32 0.2, %v1161_v3  ;;  %v1162_v22 = vadd.f32 %v1799_v25, %v1140_v4 }
 0x15f   : > { %1248 = vst.msk [vmem:[%s1903_s3 + $0x1c] sm:$0xf] %vm1240_vm7, %v1229_v13  ;;  %v1231_v20 = vpack.c.bf16 %v1213_v18, %v1213_v18  ;;  %v1214_v21 = vsel %vm1178_vm2, %v1160_v0, %v1196_v15  ;;  %v1163_v23 = vadd.f32 %v1799_v25, %v1141_v8  ;;  %v1164_v28 = vadd.f32 %v1799_v25, %v1142_v12 }
 0x160   : > { %1249 = vst.msk [vmem:[%s1903_s3 + $0x20] sm:$0xf] %vm1240_vm7, %v1230_v17  ;;  %v1232_v26 = vpack.c.bf16 %v1214_v21, %v1214_v21  ;;  %v1215_v27 = vsel %vm1179_vm3, %v1161_v3, %v1197_v19  ;;  %v1165_v29 = vadd.f32 %v1799_v25, %v1143_v16  ;;  %vm1180_vm4 = vcmp.gt.f32.partialorder %v1162_v22, 0.0 }
 0x161   : > { %1250 = vst.msk [vmem:[%s1903_s3 + $0x24] sm:$0xf] %vm1240_vm7, %v1231_v20  ;;  %v1233_v31 = vpack.c.bf16 %v1215_v27, %v1215_v27  ;;  %v1198_v32 = vmul.f32 0.2, %v1162_v22  ;;  %vm1181_vm5 = vcmp.gt.f32.partialorder %v1163_v23, 0.0  ;;  %vm1182_vm6 = vcmp.gt.f32.partialorder %v1164_v28, 0.0 }
 0x162   : > { %1251 = vst.msk [vmem:[%s1903_s3 + $0x28] sm:$0xf] %vm1240_vm7, %v1232_v26  ;;  %v1199_v33 = vmul.f32 0.2, %v1163_v23  ;;  %vm1183_vm8 = vcmp.gt.f32.partialorder %v1165_v29, 0.0  ;;  %v1166_v34 = vadd.f32 %v1799_v25, %v1144_v24  ;;  %v1167_v38 = vadd.f32 %v1799_v25, %v1145_v30 }
 0x163   : > { %1252 = vst.msk [vmem:[%s1903_s3 + $0x2c] sm:$0xf] %vm1240_vm7, %v1233_v31  ;;  %v1216_v35 = vsel %vm1180_vm4, %v1162_v22, %v1198_v32  ;;  %v1200_v36 = vmul.f32 0.2, %v1164_v28  ;;  %v1201_v37 = vmul.f32 0.2, %v1165_v29 }
 0x164   : > { %v1234_v39 = vpack.c.bf16 %v1216_v35, %v1216_v35  ;;  %v1217_v40 = vsel %vm1181_vm5, %v1163_v23, %v1199_v33  ;;  %vm1184_vm9 = vcmp.gt.f32.partialorder %v1166_v34, 0.0  ;;  %v1202_v41 = vmul.f32 0.2, %v1166_v34 }
 0x165   : > { %v1235_v42 = vpack.c.bf16 %v1217_v40, %v1217_v40  ;;  %v1218_v43 = vsel %vm1182_vm6, %v1164_v28, %v1200_v36  ;;  %v1219_v44 = vsel %vm1183_vm8, %v1165_v29, %v1201_v37  ;;  %vm1185_vm10 = vcmp.gt.f32.partialorder %v1167_v38, 0.0 }
 0x166   : > { %1253 = vst.msk [vmem:[%s1903_s3 + $0x30] sm:$0xf] %vm1240_vm7, %v1234_v39  ;;  %v1236_v45 = vpack.c.bf16 %v1218_v43, %v1218_v43  ;;  %v1237_v46 = vpack.c.bf16 %v1219_v44, %v1219_v44  ;;  %v1220_v47 = vsel %vm1184_vm9, %v1166_v34, %v1202_v41  ;;  %v1203_v48 = vmul.f32 0.2, %v1167_v38 }
 0x167   : > { %1254 = vst.msk [vmem:[%s1903_s3 + $0x34] sm:$0xf] %vm1240_vm7, %v1235_v42  ;;  %v1238_v25 = vpack.c.bf16 %v1220_v47, %v1220_v47 }
 0x168   : > { %1255 = vst.msk [vmem:[%s1903_s3 + $0x38] sm:$0xf] %vm1240_vm7, %v1236_v45  ;;  %v1221_v49 = vsel %vm1185_vm10, %v1167_v38, %v1203_v48 }
 0x169   : > { %1256 = vst.msk [vmem:[%s1903_s3 + $0x3c] sm:$0xf] %vm1240_vm7, %v1237_v46  ;;  %v1239_v50 = vpack.c.bf16 %v1221_v49, %v1221_v49 }
 0x16a   : > { %1257 = vst.msk [vmem:[%s1903_s3 + $0x40] sm:$0xf] %vm1240_vm7, %v1238_v25 }
 0x16b   : > { %1258 = vst.msk [vmem:[%s1903_s3 + $0x44] sm:$0xf] %vm1240_vm7, %v1239_v50 }
 0x16c PF: > { %s13_s14 = sadd.s32 1, %s1602_s14   ;;  %s1904_s12 = smov %s1598_s13 }
 0x16d   : > { %p10_p7 = scmp.ge.s32.totalorder %s13_s14, 6   ;;  %s1905_s13 = smov %s1907_s15 }
 0x16f   :  { %12 = sbr.rel (!%p10_p7) target bundleno = 2 (0x2), region = 81 }

</bundles_post_ra>
